<compile_context>
chip_gen: v7x
topology: tpu7x:2x2x1
jax: 0.10.0
libtpu: 0.0.40
codegen_flags: <defaults>
</compile_context>

<pallas_src>
import functools

import jax
import jax.numpy as jnp
from jax import lax
from jax.experimental import pallas as pl
from jax.experimental.pallas import tpu as pltpu

LANE = 128
SUBLANE = 8
CHUNK_ROWS = 512     # inner accumulation chunk (multiple of ACC_ROWS)
ACC_ROWS = 32        # resident f32 accumulator rows: (32, 128) = 16 KiB


def _scaled_l1_kernel(x_ref, y_ref, o_ref, acc_ref, *,
                      rows, block_rows, chunk_rows, acc_rows, per_split):
    """One grid step: fold |x - y| of a (block_rows, 128) slab into acc_ref."""
    c = pl.program_id(0)            # TensorCore split ("parallel")
    i = pl.program_id(1)            # streaming blocks ("arbitrary" / reduction)

    @pl.when(i == 0)
    def _init():
        acc_ref[...] = jnp.zeros_like(acc_ref)

    block_idx = c * per_split + i   # logical (unclamped) block index
    row_start = block_idx * block_rows
    num_chunks = block_rows // chunk_rows
    folds = chunk_rows // acc_rows

    def accumulate(masked):
        def body(ci, carry):
            start = pl.multiple_of(ci * chunk_rows, chunk_rows)
            xc = x_ref[pl.ds(start, chunk_rows), :]
            yc = y_ref[pl.ds(start, chunk_rows), :]
            # Native-dtype |x - y| (torch L1Loss semantics); cast to f32 only
            # for accumulation.
            d = jnp.abs(xc - yc).astype(jnp.float32)
            if masked:
                rid = lax.broadcasted_iota(jnp.int32, d.shape, 0)
                d = jnp.where(row_start + start + rid < rows, d, 0.0)
            if folds == 1:
                acc_ref[...] += d
            else:
                acc_ref[...] += d.reshape(folds, acc_rows, LANE).sum(axis=0)
            return carry
        lax.fori_loop(0, num_chunks, body, 0)

    interior = row_start + block_rows <= rows

    @pl.when(interior)
    def _fast():                    # mask-free hot path for interior blocks
        accumulate(False)

    @pl.when(jnp.logical_not(interior))
    def _edge():
        # Covers both the ragged last block and fully out-of-range clamped
        # duplicate blocks (row_start >= rows) which contribute exactly 0.
        accumulate(True)

    @pl.when(i == per_split - 1)
    def _finalize():
        o_ref[0, 0] = jnp.sum(acc_ref[...])     # per-split partial sum


def _chip_config():
    """(block_bytes_per_input, num_tensorcores) from the local device kind."""
    kind = ""
    try:
        kind = jax.devices()[0].device_kind.lower()
    except Exception:
        pass
    is_v7 = ("v7" in kind) or ("tpu7" in kind) or ("7x" in kind)
    is_v5e = ("v5 lite" in kind) or ("v5e" in kind) or ("v5litepod" in kind)
    # ~4 MiB of HBM bytes per input per block on v6e/v7x; ~2 MiB on v5e
    # (lower HBM BW, 16 MiB scoped-VMEM default).
    block_bytes = (2 << 20) if is_v5e else (4 << 20)
    num_cores = 2 if is_v7 else 1
    return block_bytes, num_cores


def scaled_l1_loss(x, y, scale_factor=10000.0):
    assert x.shape == y.shape, "input and target must have the same shape"
    n_elems = int(x.size)
    if n_elems == 0:
        return jnp.float32(0.0)

    xf = x.reshape(-1)
    yf = y.reshape(-1)

    tile_elems = SUBLANE * LANE                       # 1024: one (8,128) tile
    body_elems = (n_elems // tile_elems) * tile_elems
    tail_elems = n_elems - body_elems

    # Tail (< 1024 elements): plain-jnp reduction; effectively free and avoids
    # materializing padded full copies of the inputs in HBM.
    if tail_elems:
        tail_sum = jnp.sum(
            jnp.abs(xf[body_elems:] - yf[body_elems:]).astype(jnp.float32))
    else:
        tail_sum = jnp.float32(0.0)

    if body_elems == 0:
        total = tail_sum
    else:
        rows = body_elems // LANE                     # multiple of 8
        xb = xf[:body_elems].reshape(rows, LANE)
        yb = yf[:body_elems].reshape(rows, LANE)
        itemsize = jnp.dtype(x.dtype).itemsize

        block_bytes, num_cores = _chip_config()

        if rows <= 2 * CHUNK_ROWS:
            # Small input: a single block covering all rows exactly.
            block_rows = rows
            chunk_rows = rows
            acc_rows = ACC_ROWS if rows % ACC_ROWS == 0 else SUBLANE
        else:
            acc_rows = ACC_ROWS
            chunk_rows = CHUNK_ROWS
            target_rows = max(
                chunk_rows,
                (block_bytes // (itemsize * LANE)) // chunk_rows * chunk_rows)
            block_rows = min(target_rows, (rows // chunk_rows) * chunk_rows)

        num_blocks = pl.cdiv(rows, block_rows)
        num_splits = 2 if (num_cores >= 2 and num_blocks >= 2) else 1
        per_split = pl.cdiv(num_blocks, num_splits)

        def in_map(c, i):
            # Clamp so no fully out-of-range block index reaches the DMA;
            # such blocks are zeroed by the in-kernel edge mask.
            return (jnp.minimum(c * per_split + i, num_blocks - 1), 0)

        kernel = functools.partial(
            _scaled_l1_kernel, rows=rows, block_rows=block_rows,
            chunk_rows=chunk_rows, acc_rows=acc_rows, per_split=per_split)

        buf_bytes = block_rows * LANE * itemsize      # one buffered input block
        vmem_limit = int(min(32 << 20, max(16 << 20, 4 * buf_bytes + (4 << 20))))

        partials = pl.pallas_call(
            kernel,
            out_shape=jax.ShapeDtypeStruct((num_splits, 1), jnp.float32),
            grid_spec=pltpu.PrefetchScalarGridSpec(
                num_scalar_prefetch=0,
                grid=(num_splits, per_split),
                in_specs=[
                    pl.BlockSpec((block_rows, LANE), in_map),
                    pl.BlockSpec((block_rows, LANE), in_map),
                ],
                out_specs=pl.BlockSpec(
                    (1, 1), lambda c, i: (c, 0),
                    memory_space=pltpu.MemorySpace.SMEM),
                scratch_shapes=[pltpu.VMEM((acc_rows, LANE), jnp.float32)],
            ),
            compiler_params=pltpu.CompilerParams(
                dimension_semantics=("parallel", "arbitrary"),
                vmem_limit_bytes=vmem_limit,
            ),
            cost_estimate=pl.CostEstimate(
                flops=3 * body_elems,
                transcendentals=0,
                bytes_accessed=2 * body_elems * itemsize + num_splits * 4,
            ),
        )(xb, yb)

        total = jnp.sum(partials) + tail_sum

    # mean over the TRUE element count, then scale (torch L1Loss mean * scale).
    return (total / jnp.float32(n_elems)) * jnp.float32(scale_factor)


if __name__ == "__main__":
    key = jax.random.PRNGKey(0)
    k1, k2, k3, k4, k5, k6 = jax.random.split(key, 6)

    # Small NCHW-like predictor output/target.
    x = jax.random.normal(k1, (2, 4, 16, 16), dtype=jnp.float32)
    y = jax.random.normal(k2, (2, 4, 16, 16), dtype=jnp.float32)
    loss = scaled_l1_loss(x, y, scale_factor=10000.0)
    jax.block_until_ready(loss)
    ref = jnp.mean(jnp.abs(x - y)) * 10000.0
    assert jnp.allclose(loss, ref, rtol=1e-5, atol=1e-3), (loss, ref)

    # Ragged size: exercises the aligned-body kernel + <1024-element jnp tail.
    xr = jax.random.normal(k3, (3, 5, 7, 11), dtype=jnp.float32)
    yr = jax.random.normal(k4, (3, 5, 7, 11), dtype=jnp.float32)
    loss_r = scaled_l1_loss(xr, yr, scale_factor=10000.0)
    jax.block_until_ready(loss_r)
    ref_r = jnp.mean(jnp.abs(xr - yr)) * 10000.0
    assert jnp.allclose(loss_r, ref_r, rtol=1e-5, atol=1e-3), (loss_r, ref_r)

    # Moderate size: exercises the multi-block streaming path, the pl.when-
    # gated ragged edge block, and a non-empty jnp tail.
    xm = jax.random.normal(k5, (2, 3, 300, 301), dtype=jnp.float32)
    ym = jax.random.normal(k6, (2, 3, 300, 301), dtype=jnp.float32)
    loss_m = scaled_l1_loss(xm, ym, scale_factor=10000.0)
    jax.block_until_ready(loss_m)
    ref_m = jnp.mean(jnp.abs(xm - ym)) * 10000.0
    assert jnp.allclose(loss_m, ref_m, rtol=1e-4, atol=1e-2), (loss_m, ref_m)

    # bf16 pass-through: |x - y| computed in bf16 in-kernel (torch semantics),
    # accumulated in f32.
    xb16 = x.astype(jnp.bfloat16)
    yb16 = y.astype(jnp.bfloat16)
    loss_b = scaled_l1_loss(xb16, yb16, scale_factor=10000.0)
    jax.block_until_ready(loss_b)
    ref_b = jnp.mean(jnp.abs(xb16 - yb16).astype(jnp.float32)) * 10000.0
    assert jnp.allclose(loss_b, ref_b, rtol=2e-2, atol=1.0), (loss_b, ref_b)

    print("KERNEL_OK")
</pallas_src>

<mosaic_0001>
module attributes {stable_mosaic.version = 11 : i64} {
  func.func @_scaled_l1_kernel(%arg0: i32, %arg1: i32, %arg2: memref<16x128xf32, #tpu.memory_space<vmem>>, %arg3: memref<16x128xf32, #tpu.memory_space<vmem>>, %arg4: memref<1x1xf32, #tpu.memory_space<smem>>, %arg5: memref<8x128xf32, #tpu.memory_space<vmem>>) attributes {dimension_semantics = [#tpu.dimension_semantics<parallel>, #tpu.dimension_semantics<arbitrary>], iteration_bounds = array<i64: 1, 1>, scalar_prefetch = 0 : i64, scratch_operands = 1 : i64, tpu.core_type = #tpu.core_type<tc>, window_params = [{transform_indices = @transform_0, window_bounds = array<i64: 16, 128>}, {transform_indices = @transform_1, window_bounds = array<i64: 16, 128>}, {transform_indices = @transform_2, window_bounds = array<i64: 1, 1>}]} {
    %c0_i32 = arith.constant 0 : i32
    %0 = arith.cmpi eq, %arg1, %c0_i32 : i32
    %1 = arith.extui %0 : i1 to i32
    %c0_i32_0 = arith.constant 0 : i32
    %2 = arith.cmpi ne, %1, %c0_i32_0 : i32
    scf.if %2 {
      %cst = arith.constant 0.000000e+00 : f32
      %16 = vector.broadcast %cst : f32 to vector<8x128xf32>
      %c0 = arith.constant 0 : index
      %c0_7 = arith.constant 0 : index
      %17 = vector.load %arg5[%c0, %c0_7] : memref<8x128xf32, #tpu.memory_space<vmem>>, vector<8x128xf32>
      tpu.vector_store %arg5[%c0, %c0_7], %16 {strides = array<i32>} : memref<8x128xf32, #tpu.memory_space<vmem>>, vector<8x128xf32>,
    } else {
    }
    %c1_i32 = arith.constant 1 : i32
    %3 = arith.muli %arg0, %c1_i32 : i32
    %4 = arith.addi %3, %arg1 : i32
    %c16_i32 = arith.constant 16 : i32
    %5 = arith.muli %4, %c16_i32 : i32
    %c16_i32_1 = arith.constant 16 : i32
    %6 = arith.addi %5, %c16_i32_1 : i32
    %c16_i32_2 = arith.constant 16 : i32
    %7 = arith.cmpi sle, %6, %c16_i32_2 : i32
    %8 = arith.extui %7 : i1 to i32
    %c0_i32_3 = arith.constant 0 : i32
    %9 = arith.cmpi ne, %8, %c0_i32_3 : i32
    scf.if %9 {
      %c0_i32_7 = arith.constant 0 : i32
      %c16_i32_8 = arith.constant 16 : i32
      %16 = arith.muli %c0_i32_7, %c16_i32_8 : i32
      %17 = tpu.assume_multiple %16, 16 : i32
      %18 = arith.index_cast %17 : i32 to index
      %c0 = arith.constant 0 : index
      %19 = vector.load %arg2[%18, %c0] : memref<16x128xf32, #tpu.memory_space<vmem>>, vector<16x128xf32>
      %20 = arith.index_cast %17 : i32 to index
      %c0_9 = arith.constant 0 : index
      %21 = vector.load %arg3[%20, %c0_9] : memref<16x128xf32, #tpu.memory_space<vmem>>, vector<16x128xf32>
      %22 = arith.subf %19, %21 : vector<16x128xf32>
      %23 = math.absf %22 : vector<16x128xf32>
      %c0_10 = arith.constant 0 : index
      %c0_11 = arith.constant 0 : index
      %24 = vector.load %arg5[%c0_10, %c0_11] : memref<8x128xf32, #tpu.memory_space<vmem>>, vector<8x128xf32>
      %25 = vector.shape_cast %23 : vector<16x128xf32> to vector<2x8x128xf32>
      %cst = arith.constant dense<0.000000e+00> : vector<8x128xf32>
      %26 = vector.multi_reduction <add>, %25, %cst [0] : vector<2x8x128xf32> to vector<8x128xf32>
      %27 = arith.addf %24, %26 : vector<8x128xf32>
      %c0_12 = arith.constant 0 : index
      %c0_13 = arith.constant 0 : index
      %28 = vector.load %arg5[%c0_12, %c0_13] : memref<8x128xf32, #tpu.memory_space<vmem>>, vector<8x128xf32>
      tpu.vector_store %arg5[%c0_12, %c0_13], %27 {strides = array<i32>} : memref<8x128xf32, #tpu.memory_space<vmem>>, vector<8x128xf32>,
      %c1_i32_14 = arith.constant 1 : i32
    } else {
    }
    %true = arith.constant true
    %10 = arith.xori %7, %true : i1
    %11 = arith.extui %10 : i1 to i32
    %c0_i32_4 = arith.constant 0 : i32
    %12 = arith.cmpi ne, %11, %c0_i32_4 : i32
    scf.if %12 {
      %c0_i32_7 = arith.constant 0 : i32
      %c16_i32_8 = arith.constant 16 : i32
      %16 = arith.muli %c0_i32_7, %c16_i32_8 : i32
      %17 = tpu.assume_multiple %16, 16 : i32
      %18 = arith.index_cast %17 : i32 to index
      %c0 = arith.constant 0 : index
      %19 = vector.load %arg2[%18, %c0] : memref<16x128xf32, #tpu.memory_space<vmem>>, vector<16x128xf32>
      %20 = arith.index_cast %17 : i32 to index
      %c0_9 = arith.constant 0 : index
      %21 = vector.load %arg3[%20, %c0_9] : memref<16x128xf32, #tpu.memory_space<vmem>>, vector<16x128xf32>
      %22 = arith.subf %19, %21 : vector<16x128xf32>
      %23 = math.absf %22 : vector<16x128xf32>
      %24 = tpu.iota {dimensions = array<i32: 0>} : vector<16x128xi32>
      %25 = arith.addi %5, %17 : i32
      %26 = vector.broadcast %25 : i32 to vector<16x128xi32>
      %27 = arith.addi %26, %24 : vector<16x128xi32>
      %c16_i32_10 = arith.constant 16 : i32
      %28 = vector.broadcast %c16_i32_10 : i32 to vector<16x128xi32>
      %29 = arith.cmpi slt, %27, %28 : vector<16x128xi32>
      %cst = arith.constant 0.000000e+00 : f32
      %30 = vector.broadcast %cst : f32 to vector<16x128xf32>
      %31 = arith.select %29, %23, %30 : vector<16x128xi1>, vector<16x128xf32>
      %c0_11 = arith.constant 0 : index
      %c0_12 = arith.constant 0 : index
      %32 = vector.load %arg5[%c0_11, %c0_12] : memref<8x128xf32, #tpu.memory_space<vmem>>, vector<8x128xf32>
      %33 = vector.shape_cast %31 : vector<16x128xf32> to vector<2x8x128xf32>
      %cst_13 = arith.constant dense<0.000000e+00> : vector<8x128xf32>
      %34 = vector.multi_reduction <add>, %33, %cst_13 [0] : vector<2x8x128xf32> to vector<8x128xf32>
      %35 = arith.addf %32, %34 : vector<8x128xf32>
      %c0_14 = arith.constant 0 : index
      %c0_15 = arith.constant 0 : index
      %36 = vector.load %arg5[%c0_14, %c0_15] : memref<8x128xf32, #tpu.memory_space<vmem>>, vector<8x128xf32>
      tpu.vector_store %arg5[%c0_14, %c0_15], %35 {strides = array<i32>} : memref<8x128xf32, #tpu.memory_space<vmem>>, vector<8x128xf32>,
      %c1_i32_16 = arith.constant 1 : i32
    } else {
    }
    %c0_i32_5 = arith.constant 0 : i32
    %13 = arith.cmpi eq, %arg1, %c0_i32_5 : i32
    %14 = arith.extui %13 : i1 to i32
    %c0_i32_6 = arith.constant 0 : i32
    %15 = arith.cmpi ne, %14, %c0_i32_6 : i32
    scf.if %15 {
      %c0 = arith.constant 0 : index
      %c0_7 = arith.constant 0 : index
      %16 = vector.load %arg5[%c0, %c0_7] : memref<8x128xf32, #tpu.memory_space<vmem>>, vector<8x128xf32>
      %17 = vector.shape_cast %16 : vector<8x128xf32> to vector<1x8x128xf32>
      %cst = arith.constant dense<0.000000e+00> : vector<1xf32>
      %18 = vector.multi_reduction <add>, %17, %cst [1, 2] : vector<1x8x128xf32> to vector<1xf32>
      %19 = vector.shape_cast %18 : vector<1xf32> to vector<1x1x1xf32>
      %20 = vector.extract %19[0, 0, 0] : f32 from vector<1x1x1xf32>
      %c0_8 = arith.constant 0 : index
      %c0_9 = arith.constant 0 : index
      %21 = memref.load %arg4[%c0_8, %c0_9] : memref<1x1xf32, #tpu.memory_space<smem>>
      memref.store %20, %arg4[%c0_8, %c0_9] : memref<1x1xf32, #tpu.memory_space<smem>>
    } else {
    }
    return
  }
  func.func @transform_0(%arg0: i32, %arg1: i32) -> (i32, i32) {
    %c1_i32 = arith.constant 1 : i32
    %0 = arith.muli %arg0, %c1_i32 : i32
    %1 = arith.addi %0, %arg1 : i32
    %c0_i32 = arith.constant 0 : i32
    %2 = arith.minsi %1, %c0_i32 : i32
    %c0_i32_0 = arith.constant 0 : i32
    %c0_i32_1 = arith.constant 0 : i32
    return %2, %c0_i32_0 : i32, i32
  }
  func.func @transform_1(%arg0: i32, %arg1: i32) -> (i32, i32) {
    %c1_i32 = arith.constant 1 : i32
    %0 = arith.muli %arg0, %c1_i32 : i32
    %1 = arith.addi %0, %arg1 : i32
    %c0_i32 = arith.constant 0 : i32
    %2 = arith.minsi %1, %c0_i32 : i32
    %c0_i32_0 = arith.constant 0 : i32
    %c0_i32_1 = arith.constant 0 : i32
    return %2, %c0_i32_0 : i32, i32
  }
  func.func @transform_2(%arg0: i32, %arg1: i32) -> (i32, i32) {
    %c0_i32 = arith.constant 0 : i32
    %c0_i32_0 = arith.constant 0 : i32
    return %arg0, %c0_i32 : i32, i32
  }
}

</mosaic_0001>

<bundles_post_ra>
// kernel: tpu_custom_call.1
= control target key start
LH: loop header
LB: loop body
LE: loop exit
PB: predicated region body
PF: predicated region fallthrough
CT: control target
= control target key end

     0   :  { %7 = vsyncpa [#allocation4], 0  ;;  %s268_s0 = inlined_call_operand.hbm [shape: f32[16,128], index: 0, kind: input, shape index: {}]   ;;  %s269_s1 = inlined_call_operand.hbm [shape: f32[16,128], index: 1, kind: input, shape index: {}]   ;;  %s270_s2 = inlined_call_operand.hbm [shape: f32[1,1], index: 2, kind: output, shape index: {}]  }
   0x1   :  { %8 = vsyncpa [#allocation7], 0 }
   0x2   :  { %9 = vsyncpa [#allocation5], 0  ;;  %s212_s9 = smov [#allocation3]   ;;  %s152_s13 = scalar_lea.hbm %s268_s0, 256 }
   0x3   :  { %s21_s10 = sshll.u32 %s212_s9, 4  ;;  %p153_p0 = scmp.ne.s32.totalorder %s268_s0, %s152_s13  ;;  %s22_s10 = int_to_ptr.vmem [resolvable:$true] %s21_s10 }
   0x4   :  { %p156_p1 = scmp.lt.u32.totalorder %s152_s13, %s268_s0 }
   0x6   :  { %p158_p2 = pnand %p156_p1, %p153_p0 }
   0x8   :  { %161 = shalt.err (!%p158_p2)
}
   0x9   :  { %s162_s18 = scalar_lea.vmem %s22_s10, 256  ;;  %p167_p4 = scmp.lt.s32.totalorder %s22_s10, %s22_s10 }
   0xa   :  { %p163_p3 = scmp.ne.s32.totalorder %s22_s10, %s162_s18  ;;  %p168_p5 = scmp.lt.s32.totalorder %s162_s18, %s162_s18 }
   0xc   :  { %p169_p6 = por %p168_p5, %p167_p4 }
   0xe   :  { %p170_p7 = pnand %p169_p6, %p163_p3 }
  0x10   :  { %173 = shalt.err (!%p170_p7)
}
  0x11   :  { %s213_s19 = smov 128   ;;  %s214_s20 = smov 8  }
  0x12   :  { %27 = dma.hbm_to_vmem [thread:$0]  %s268_s0, 256, %s22_s10, [#allocation4], %s213_s19, %s213_s19, %s214_s20  }
  0x13   :  { %s215_s23 = smov [#allocation6]   ;;  %s174_s27 = scalar_lea.hbm %s269_s1, 256 }
  0x14   :  { %s39_s24 = sshll.u32 %s215_s23, 4  ;;  %p175_p8 = scmp.ne.s32.totalorder %s269_s1, %s174_s27  ;;  %s40_s24 = int_to_ptr.vmem [resolvable:$true] %s39_s24 }
  0x15   :  { %p178_p9 = scmp.lt.u32.totalorder %s174_s27, %s269_s1 }
  0x17   :  { %p180_p10 = pnand %p178_p9, %p175_p8 }
  0x19   :  { %183 = shalt.err (!%p180_p10)
}
  0x1a   :  { %s184_s4 = scalar_lea.vmem %s40_s24, 256  ;;  %p189_p12 = scmp.lt.s32.totalorder %s40_s24, %s40_s24 }
  0x1b   :  { %p185_p11 = scmp.ne.s32.totalorder %s40_s24, %s184_s4  ;;  %p190_p13 = scmp.lt.s32.totalorder %s184_s4, %s184_s4 }
  0x1d   :  { %p191_p0 = por %p190_p13, %p189_p12 }
  0x1f   :  { %p192_p1 = pnand %p191_p0, %p185_p11 }
  0x21   :  { %195 = shalt.err (!%p192_p1)
}
  0x22   :  { %45 = dma.hbm_to_vmem [thread:$0]  %s269_s1, 256, %s40_s24, [#allocation7], %s213_s19, %s213_s19, %s214_s20  }
  0x23   :  { %206 = dma.done.wait [#allocation4], 256  }
  0x24   :  { %207 = vsyncadd [#allocation4], 4294967040 }
  0x25   :  { %208 = dma.done.wait [#allocation7], 256  }
  0x26   :  { %209 = vsyncadd [#allocation7], 4294967040  ;;  %v72_v0 = vld [vmem:[#allocation3] sm:$0xff]  ;;  %v73_v1 = vld [vmem:[#allocation3 + $0x8] sm:$0xff]  ;;  %s196_s8 = scalar_lea.hbm %s270_s2, 16 }
  0x27   :  { %v74_v2 = vld [vmem:[#allocation6] sm:$0xff]  ;;  %v75_v3 = vld [vmem:[#allocation6 + $0x8] sm:$0xff]  ;;  %p197_p2 = scmp.ne.s32.totalorder %s270_s2, %s196_s8  ;;  %p200_p3 = scmp.lt.u32.totalorder %s196_s8, %s270_s2 }
  0x28   :  { %v76_v4 = vsub.f32 %v72_v0, %v74_v2  ;;  %v77_v5 = vsub.f32 %v73_v1, %v75_v3 }
  0x29   :  { %p202_p4 = pnand %p200_p3, %p197_p2 }
  0x2a   :  { %v78_v6 = vand.u32 2147483647, %v76_v4  ;;  %v79_v7 = vand.u32 2147483647, %v77_v5 }
  0x2c   :  { %v81_v8 = vadd.f32 %v79_v7, %v78_v6 }
  0x2e   :  { %115 = vadd.xlane.f32.xlu0 %v81_v8 }
  0xbb   :  { %v116_v9 = vpop.xlane.xlu0 %115 }
  0xbc   :  { %v117_v10 = vrot.slane %v116_v9, 4 }
  0xbe   :  { %v118_v11 = vadd.f32 %v117_v10, %v116_v9 }
  0xc0   :  { %v119_v12 = vrot.slane %v118_v11, 2 }
  0xc2   :  { %v120_v13 = vadd.f32 %v119_v12, %v118_v11 }
  0xc4   :  { %v121_v14 = vrot.slane %v120_v13, 1 }
  0xc6   :  { %v122_v15 = vadd.f32 %v121_v14, %v120_v13 }
  0xc8   :  { %145 = vpush %v122_v15 }
  0xf9   :  { %s146_s1 = spop %145 }
  0xfa   :  { %125 = sst [smem:[#allocation8]] %s146_s1 }
  0xfb   :  { %205 = shalt.err (!%p202_p4)
}
  0xfc   :  { %s216_s13 = smov [#allocation8]  }
  0xfd   :  { %133 = dma.smem_to_hbm %s216_s13, 16, %s270_s2, [#allocation5]  }
  0xfe   :  { %210 = dma.done.wait [#allocation5], 16  }
  0xff   :  { %211 = vsyncadd [#allocation5], 4294967280 }
 0x100   :  { %137 = sfence }
 0x101   :  { %138 = vsyncpa [#allocation4], 1 }
 0x102   :  { %139 = vsyncpa [#allocation7], 1 }
 0x103   :  { %140 = vsyncpa [#allocation5], 1 }

</bundles_post_ra>
